<compile_context>
chip_gen: v7x
topology: tpu7x:2x2x1
jax: 0.10.0
libtpu: 0.0.40
codegen_flags: <defaults>
</compile_context>

<pallas_src>
import math

import jax
import jax.numpy as jnp
from jax.experimental import pallas as pl
from jax.experimental.pallas import tpu as pltpu

KH = KW = 3   # 3x3 conv
LANE = 128    # TPU lane width


def _round_up(x, m):
    return (x + m - 1) // m * m


def _vmem_limit_bytes():
    """Scoped VMEM limit: ~75% of physical (96 MiB v5e/v6e, 48 MiB v7x)."""
    try:
        phys = int(pltpu.get_tpu_info().vmem_capacity_bytes)
    except Exception:
        phys = 64 * 1024 * 1024          # conservative (v7x-sized) fallback
    return min(phys * 3 // 4, 100 * 1024 * 1024)


def _pick_tile_h(ho, wo, cp, out_bytes, vmem_limit):
    """Largest divisor of Ho whose blocks (incl. weights + temps) fit VMEM."""
    in_row = 2 * (wo + 1) * (2 * cp) * 2                       # 2 padded rows, bf16
    out_row = wo * cp * out_bytes
    tmp_row = 4 * (wo + 1) * (2 * cp) * 2 + wo * cp * 4        # in-kernel temporaries
    per_th = 2 * in_row + 2 * out_row + tmp_row                # double-buffered in/out
    fixed = 2 * (KH * KW * cp * cp * 2)                        # double-buffered weights
    fixed += 2 * in_row + 2 * cp * 4                           # boundary rows + bias
    budget = max(per_th, vmem_limit - fixed - 6 * 1024 * 1024)
    max_th = max(1, budget // per_th)
    th = 1
    for d in range(1, ho + 1):
        if ho % d == 0 and d <= max_th:
            th = d
    # TODO(synk): prime Ho degrades to th=1 (correct but fine-grained); a ragged
    # last tile via Element-indexed input would decouple tiling from Ho.
    return th


def _downsample_kernel(xm_ref, xb_ref, w_ref, b_ref, o_ref):
    """One (row-tile, batch) output block per grid step.

    xm_ref : (1, TH, 2, Wo+1, 2*Cp) bf16  main slab: padded rows [2*j*TH, 2*(j+1)*TH)
             as (row-pair h2, H-parity), W-parity folded into the channel axis.
    xb_ref : (1, 1, 2, Wo+1, 2*Cp)  bf16  boundary row-pair at h2=(j+1)*TH
             (only H-parity 0, i.e. padded row 2*(j+1)*TH, is used).
    w_ref  : (3, 3*Cp, Cp)          bf16  per kh: rows [0:2Cp)=kw0|kw1, [2Cp:3Cp)=kw2.
    b_ref  : (1, Cp)                f32
    o_ref  : (1, TH, Wo, Cp)
    """
    _, th, _, wo1, cp2 = xm_ref.shape
    wo = wo1 - 1
    cp = cp2 // 2

    xm = xm_ref[0]                       # (TH, 2, Wo+1, 2Cp)
    xb = xb_ref[0][:, 0]                 # (1, Wo+1, 2Cp) : padded row 2*(j+1)*TH

    r0 = xm[:, 0]                        # kh=0 tap: padded rows 2*i
    r1 = xm[:, 1]                        # kh=1 tap: padded rows 2*i+1
    if th > 1:                           # kh=2 tap: padded rows 2*i+2
        r2 = jnp.concatenate([xm[1:, 0], xb], axis=0)
    else:
        r2 = xb

    acc = jnp.zeros((th * wo, cp), jnp.float32)
    for kh, r in enumerate((r0, r1, r2)):
        # kw=0,1: both W-parities at w2 = j  ->  one deep K=2*Cp GEMM
        a = r[:, :wo, :].reshape(th * wo, cp2)
        acc = acc + jnp.dot(a, w_ref[kh, :cp2, :],
                            preferred_element_type=jnp.float32)
        # kw=2: even W-parity at w2 = j+1   ->  K=Cp GEMM
        cc = r[:, 1:, :cp].reshape(th * wo, cp)
        acc = acc + jnp.dot(cc, w_ref[kh, cp2:, :],
                            preferred_element_type=jnp.float32)

    acc = acc + b_ref[...]
    o_ref[...] = acc.reshape(1, th, wo, cp).astype(o_ref.dtype)


def downsample_nhwc(x_nhwc, weight, bias, *, out_dtype=None):
    """3x3 / stride-2 / pad-1 conv on NHWC input.  Returns (N, Ho, Wo, C)."""
    n, h, w, c = x_nhwc.shape
    assert weight.shape == (c, c, KH, KW), weight.shape
    ho, wo = (h + 1) // 2, (w + 1) // 2
    cp = _round_up(c, LANE)
    out_dtype = x_nhwc.dtype if out_dtype is None else out_dtype
    out_bytes = jnp.dtype(out_dtype).itemsize

    # One fused cast+pad pass: +1 halo top/left, enough bottom/right to reach
    # (2*Ho+2, 2*Wo+2), channels lane-padded to Cp.  The reshape below is a
    # pure row-major bitcast (W split into (w2, parity), parity merged into
    # channels) -- no extra HBM traffic, no im2col tensor.
    x = x_nhwc.astype(jnp.bfloat16)
    xp = jnp.pad(x, ((0, 0), (1, 2 * ho + 1 - h), (1, 2 * wo + 1 - w), (0, cp - c)))
    xr = xp.reshape(n, ho + 1, 2, wo + 1, 2 * cp)

    # Weights: (Cout, Cin, KH, KW) -> (kh, kw*Cp + cin, cout), bf16.
    w_t = jnp.transpose(weight, (2, 3, 1, 0))                  # (KH, KW, Cin, Cout)
    w_t = jnp.pad(w_t, ((0, 0), (0, 0), (0, cp - c), (0, cp - c)))
    w_full = w_t.reshape(KH, KW * cp, cp).astype(jnp.bfloat16)
    b_row = jnp.pad(bias, (0, cp - c)).reshape(1, cp).astype(jnp.float32)

    vmem_limit = _vmem_limit_bytes()
    tile_h = _pick_tile_h(ho, wo, cp, out_bytes, vmem_limit)
    n_tiles = ho // tile_h

    out = pl.pallas_call(
        _downsample_kernel,
        out_shape=jax.ShapeDtypeStruct((n, ho, wo, cp), out_dtype),
        grid=(n_tiles, n),   # spatial axis first so v7x megacore shards even at N=1
        in_specs=[
            # main slab: padded rows [2*j*TH, 2*(j+1)*TH)
            pl.BlockSpec((1, tile_h, 2, wo + 1, 2 * cp),
                         lambda j, b: (b, j, 0, 0, 0)),
            # boundary row-pair at h2 = (j+1)*TH (the +1-row halo of the slab)
            pl.BlockSpec((1, 1, 2, wo + 1, 2 * cp),
                         lambda j, b: (b, (j + 1) * tile_h, 0, 0, 0)),
            pl.BlockSpec((KH, KW * cp, cp), lambda j, b: (0, 0, 0)),
            pl.BlockSpec((1, cp), lambda j, b: (0, 0)),
        ],
        out_specs=pl.BlockSpec((1, tile_h, wo, cp), lambda j, b: (b, j, 0, 0)),
        compiler_params=pltpu.CompilerParams(
            dimension_semantics=("parallel", "parallel"),
            vmem_limit_bytes=vmem_limit,
        ),
    )(xr, xr, w_full, b_row)

    return out[..., :c] if cp != c else out


def downsample_forward(x_nchw, temb, weight, bias):
    """Matches DownSample.forward(x, temb): temb is ignored, conv(k=3, s=2, p=1)."""
    del temb  # unused by the PyTorch module as well
    # The PyTorch module is NCHW; the kernel is NHWC-native.  In an NHWC model
    # call downsample_nhwc directly and both transposes (2 extra HBM passes,
    # plus the output could then stay bf16) disappear.
    x = jnp.transpose(x_nchw, (0, 2, 3, 1))
    out = downsample_nhwc(x, weight, bias, out_dtype=x_nchw.dtype)
    return jnp.transpose(out, (0, 3, 1, 2))


def init_downsample_params(key, in_ch):
    """Deterministic xavier_uniform_ weight / zeros bias, as in DownSample.initialize()."""
    fan_in = in_ch * KH * KW
    fan_out = in_ch * KH * KW
    bound = math.sqrt(6.0 / (fan_in + fan_out))
    weight = jax.random.uniform(
        key, (in_ch, in_ch, KH, KW), dtype=jnp.float32, minval=-bound, maxval=bound)
    bias = jnp.zeros((in_ch,), dtype=jnp.float32)
    return weight, bias


if __name__ == "__main__":
    key = jax.random.PRNGKey(0)
    k_x, k_t, k_w = jax.random.split(key, 3)

    N, C, H, W = 2, 4, 16, 16
    x = jax.random.normal(k_x, (N, C, H, W), dtype=jnp.float32)
    temb = jax.random.normal(k_t, (N, 32), dtype=jnp.float32)  # unused, per module

    weight, bias = init_downsample_params(k_w, C)

    fwd = jax.jit(downsample_forward)
    out = fwd(x, temb, weight, bias)
    out = jax.block_until_ready(out)

    # Reference (plain XLA conv, f32). Kernel uses bf16 operands with f32
    # accumulation, so tolerance is loosened accordingly.
    ref = jax.lax.conv_general_dilated(
        x, weight, window_strides=(2, 2), padding=((1, 1), (1, 1)),
        dimension_numbers=("NCHW", "OIHW", "NCHW")) + bias.reshape(1, C, 1, 1)

    assert out.shape == (N, C, H // 2, W // 2), out.shape
    max_err = float(jnp.max(jnp.abs(out - ref)))
    assert jnp.allclose(out, ref, atol=5e-2, rtol=5e-2), max_err

    print("KERNEL_OK")
</pallas_src>

<mosaic_0001>
module attributes {stable_mosaic.version = 11 : i64} {
  func.func @_downsample_kernel(%arg0: i32, %arg1: i32, %arg2: memref<1x8x2x9x256xbf16, #tpu.memory_space<vmem>>, %arg3: memref<1x1x2x9x256xbf16, #tpu.memory_space<vmem>>, %arg4: memref<3x384x128xbf16, #tpu.memory_space<vmem>>, %arg5: memref<1x128xf32, #tpu.memory_space<vmem>>, %arg6: memref<1x8x8x128xf32, #tpu.memory_space<vmem>>) attributes {dimension_semantics = [#tpu.dimension_semantics<parallel>, #tpu.dimension_semantics<parallel>], iteration_bounds = array<i64: 1, 2>, scalar_prefetch = 0 : i64, scratch_operands = 0 : i64, tpu.core_type = #tpu.core_type<tc>, window_params = [{transform_indices = @transform_0, window_bounds = array<i64: 1, 8, 2, 9, 256>}, {transform_indices = @transform_1, window_bounds = array<i64: 1, 1, 2, 9, 256>}, {pipeline_mode = #tpu.pipeline_mode<synchronous>, transform_indices = @transform_2, window_bounds = array<i64: 3, 384, 128>}, {pipeline_mode = #tpu.pipeline_mode<synchronous>, transform_indices = @transform_3, window_bounds = array<i64: 1, 128>}, {transform_indices = @transform_4, window_bounds = array<i64: 1, 8, 8, 128>}]} {
    %c0 = arith.constant 0 : index
    %c0_0 = arith.constant 0 : index
    %c0_1 = arith.constant 0 : index
    %c0_2 = arith.constant 0 : index
    %c0_3 = arith.constant 0 : index
    %0 = vector.load %arg2[%c0, %c0_0, %c0_1, %c0_2, %c0_3] : memref<1x8x2x9x256xbf16, #tpu.memory_space<vmem>>, vector<1x8x2x9x256xbf16>
    %1 = vector.shape_cast %0 : vector<1x8x2x9x256xbf16> to vector<8x2x9x256xbf16>
    %c0_4 = arith.constant 0 : index
    %c0_5 = arith.constant 0 : index
    %c0_6 = arith.constant 0 : index
    %c0_7 = arith.constant 0 : index
    %c0_8 = arith.constant 0 : index
    %2 = vector.load %arg3[%c0_4, %c0_5, %c0_6, %c0_7, %c0_8] : memref<1x1x2x9x256xbf16, #tpu.memory_space<vmem>>, vector<1x1x2x9x256xbf16>
    %3 = vector.shape_cast %2 : vector<1x1x2x9x256xbf16> to vector<1x2x9x256xbf16>
    %4 = vector.extract_strided_slice %3 {offsets = [0, 0, 0, 0], sizes = [1, 1, 9, 256], strides = [1, 1, 1, 1]} : vector<1x2x9x256xbf16> to vector<1x1x9x256xbf16>
    %5 = vector.shape_cast %4 : vector<1x1x9x256xbf16> to vector<1x9x256xbf16>
    %6 = vector.extract_strided_slice %1 {offsets = [0, 0, 0, 0], sizes = [8, 1, 9, 256], strides = [1, 1, 1, 1]} : vector<8x2x9x256xbf16> to vector<8x1x9x256xbf16>
    %7 = vector.shape_cast %6 : vector<8x1x9x256xbf16> to vector<8x9x256xbf16>
    %8 = vector.extract_strided_slice %1 {offsets = [0, 1, 0, 0], sizes = [8, 1, 9, 256], strides = [1, 1, 1, 1]} : vector<8x2x9x256xbf16> to vector<8x1x9x256xbf16>
    %9 = vector.shape_cast %8 : vector<8x1x9x256xbf16> to vector<8x9x256xbf16>
    %10 = vector.extract_strided_slice %1 {offsets = [1, 0, 0, 0], sizes = [7, 1, 9, 256], strides = [1, 1, 1, 1]} : vector<8x2x9x256xbf16> to vector<7x1x9x256xbf16>
    %11 = vector.shape_cast %10 : vector<7x1x9x256xbf16> to vector<7x9x256xbf16>
    %12 = tpu.concatenate %11, %5 in 0 : vector<7x9x256xbf16>, vector<1x9x256xbf16> -> vector<8x9x256xbf16>
    %cst = arith.constant 0.000000e+00 : f32
    %13 = vector.broadcast %cst : f32 to vector<64x128xf32>
    %14 = vector.extract_strided_slice %7 {offsets = [0, 0, 0], sizes = [8, 8, 256], strides = [1, 1, 1]} : vector<8x9x256xbf16> to vector<8x8x256xbf16>
    %15 = vector.shape_cast %14 : vector<8x8x256xbf16> to vector<64x256xbf16>
    %c0_9 = arith.constant 0 : index
    %c0_10 = arith.constant 0 : index
    %c0_11 = arith.constant 0 : index
    %16 = vector.load %arg4[%c0_9, %c0_10, %c0_11] : memref<3x384x128xbf16, #tpu.memory_space<vmem>>, vector<1x256x128xbf16>
    %17 = vector.shape_cast %16 : vector<1x256x128xbf16> to vector<256x128xbf16>
    %cst_12 = arith.constant dense<0.000000e+00> : vector<64x128xf32>
    %18 = tpu.matmul %15, %17, %cst_12 {dimension_numbers = #tpu.dot_dimension_numbers<[1], [0], [0], [1], [0, 0, 1, 1], [], []>} : vector<64x256xbf16>, vector<256x128xbf16>, vector<64x128xf32> -> vector<64x128xf32>
    %19 = arith.addf %13, %18 : vector<64x128xf32>
    %20 = vector.extract_strided_slice %7 {offsets = [0, 1, 0], sizes = [8, 8, 128], strides = [1, 1, 1]} : vector<8x9x256xbf16> to vector<8x8x128xbf16>
    %21 = vector.shape_cast %20 : vector<8x8x128xbf16> to vector<64x128xbf16>
    %c0_13 = arith.constant 0 : index
    %c256 = arith.constant 256 : index
    %c0_14 = arith.constant 0 : index
    %22 = vector.load %arg4[%c0_13, %c256, %c0_14] : memref<3x384x128xbf16, #tpu.memory_space<vmem>>, vector<1x128x128xbf16>
    %23 = vector.shape_cast %22 : vector<1x128x128xbf16> to vector<128x128xbf16>
    %cst_15 = arith.constant dense<0.000000e+00> : vector<64x128xf32>
    %24 = tpu.matmul %21, %23, %cst_15 {dimension_numbers = #tpu.dot_dimension_numbers<[1], [0], [0], [1], [0, 0, 1, 1], [], []>} : vector<64x128xbf16>, vector<128x128xbf16>, vector<64x128xf32> -> vector<64x128xf32>
    %25 = arith.addf %19, %24 : vector<64x128xf32>
    %26 = vector.extract_strided_slice %9 {offsets = [0, 0, 0], sizes = [8, 8, 256], strides = [1, 1, 1]} : vector<8x9x256xbf16> to vector<8x8x256xbf16>
    %27 = vector.shape_cast %26 : vector<8x8x256xbf16> to vector<64x256xbf16>
    %c1 = arith.constant 1 : index
    %c0_16 = arith.constant 0 : index
    %c0_17 = arith.constant 0 : index
    %28 = vector.load %arg4[%c1, %c0_16, %c0_17] : memref<3x384x128xbf16, #tpu.memory_space<vmem>>, vector<1x256x128xbf16>
    %29 = vector.shape_cast %28 : vector<1x256x128xbf16> to vector<256x128xbf16>
    %cst_18 = arith.constant dense<0.000000e+00> : vector<64x128xf32>
    %30 = tpu.matmul %27, %29, %cst_18 {dimension_numbers = #tpu.dot_dimension_numbers<[1], [0], [0], [1], [0, 0, 1, 1], [], []>} : vector<64x256xbf16>, vector<256x128xbf16>, vector<64x128xf32> -> vector<64x128xf32>
    %31 = arith.addf %25, %30 : vector<64x128xf32>
    %32 = vector.extract_strided_slice %9 {offsets = [0, 1, 0], sizes = [8, 8, 128], strides = [1, 1, 1]} : vector<8x9x256xbf16> to vector<8x8x128xbf16>
    %33 = vector.shape_cast %32 : vector<8x8x128xbf16> to vector<64x128xbf16>
    %c1_19 = arith.constant 1 : index
    %c256_20 = arith.constant 256 : index
    %c0_21 = arith.constant 0 : index
    %34 = vector.load %arg4[%c1_19, %c256_20, %c0_21] : memref<3x384x128xbf16, #tpu.memory_space<vmem>>, vector<1x128x128xbf16>
    %35 = vector.shape_cast %34 : vector<1x128x128xbf16> to vector<128x128xbf16>
    %cst_22 = arith.constant dense<0.000000e+00> : vector<64x128xf32>
    %36 = tpu.matmul %33, %35, %cst_22 {dimension_numbers = #tpu.dot_dimension_numbers<[1], [0], [0], [1], [0, 0, 1, 1], [], []>} : vector<64x128xbf16>, vector<128x128xbf16>, vector<64x128xf32> -> vector<64x128xf32>
    %37 = arith.addf %31, %36 : vector<64x128xf32>
    %38 = vector.extract_strided_slice %12 {offsets = [0, 0, 0], sizes = [8, 8, 256], strides = [1, 1, 1]} : vector<8x9x256xbf16> to vector<8x8x256xbf16>
    %39 = vector.shape_cast %38 : vector<8x8x256xbf16> to vector<64x256xbf16>
    %c2 = arith.constant 2 : index
    %c0_23 = arith.constant 0 : index
    %c0_24 = arith.constant 0 : index
    %40 = vector.load %arg4[%c2, %c0_23, %c0_24] : memref<3x384x128xbf16, #tpu.memory_space<vmem>>, vector<1x256x128xbf16>
    %41 = vector.shape_cast %40 : vector<1x256x128xbf16> to vector<256x128xbf16>
    %cst_25 = arith.constant dense<0.000000e+00> : vector<64x128xf32>
    %42 = tpu.matmul %39, %41, %cst_25 {dimension_numbers = #tpu.dot_dimension_numbers<[1], [0], [0], [1], [0, 0, 1, 1], [], []>} : vector<64x256xbf16>, vector<256x128xbf16>, vector<64x128xf32> -> vector<64x128xf32>
    %43 = arith.addf %37, %42 : vector<64x128xf32>
    %44 = vector.extract_strided_slice %12 {offsets = [0, 1, 0], sizes = [8, 8, 128], strides = [1, 1, 1]} : vector<8x9x256xbf16> to vector<8x8x128xbf16>
    %45 = vector.shape_cast %44 : vector<8x8x128xbf16> to vector<64x128xbf16>
    %c2_26 = arith.constant 2 : index
    %c256_27 = arith.constant 256 : index
    %c0_28 = arith.constant 0 : index
    %46 = vector.load %arg4[%c2_26, %c256_27, %c0_28] : memref<3x384x128xbf16, #tpu.memory_space<vmem>>, vector<1x128x128xbf16>
    %47 = vector.shape_cast %46 : vector<1x128x128xbf16> to vector<128x128xbf16>
    %cst_29 = arith.constant dense<0.000000e+00> : vector<64x128xf32>
    %48 = tpu.matmul %45, %47, %cst_29 {dimension_numbers = #tpu.dot_dimension_numbers<[1], [0], [0], [1], [0, 0, 1, 1], [], []>} : vector<64x128xbf16>, vector<128x128xbf16>, vector<64x128xf32> -> vector<64x128xf32>
    %49 = arith.addf %43, %48 : vector<64x128xf32>
    %c0_30 = arith.constant 0 : index
    %c0_31 = arith.constant 0 : index
    %50 = vector.load %arg5[%c0_30, %c0_31] : memref<1x128xf32, #tpu.memory_space<vmem>>, vector<1x128xf32>
    %51 = vector.broadcast %50 : vector<1x128xf32> to vector<64x128xf32>
    %52 = arith.addf %49, %51 : vector<64x128xf32>
    %53 = vector.shape_cast %52 : vector<64x128xf32> to vector<1x8x8x128xf32>
    %c0_32 = arith.constant 0 : index
    %c0_33 = arith.constant 0 : index
    %c0_34 = arith.constant 0 : index
    %c0_35 = arith.constant 0 : index
    %54 = vector.load %arg6[%c0_32, %c0_33, %c0_34, %c0_35] : memref<1x8x8x128xf32, #tpu.memory_space<vmem>>, vector<1x8x8x128xf32>
    tpu.vector_store %arg6[%c0_32, %c0_33, %c0_34, %c0_35], %53 {strides = array<i32>} : memref<1x8x8x128xf32, #tpu.memory_space<vmem>>, vector<1x8x8x128xf32>,
    return
  }
  func.func @transform_0(%arg0: i32, %arg1: i32) -> (i32, i32, i32, i32, i32) {
    %c0_i32 = arith.constant 0 : i32
    %c0_i32_0 = arith.constant 0 : i32
    %c0_i32_1 = arith.constant 0 : i32
    %c0_i32_2 = arith.constant 0 : i32
    return %arg1, %arg0, %c0_i32, %c0_i32_0, %c0_i32_1 : i32, i32, i32, i32, i32
  }
  func.func @transform_1(%arg0: i32, %arg1: i32) -> (i32, i32, i32, i32, i32) {
    %c1_i32 = arith.constant 1 : i32
    %0 = arith.addi %arg0, %c1_i32 : i32
    %c8_i32 = arith.constant 8 : i32
    %1 = arith.muli %0, %c8_i32 : i32
    %c0_i32 = arith.constant 0 : i32
    %c0_i32_0 = arith.constant 0 : i32
    %c0_i32_1 = arith.constant 0 : i32
    %c0_i32_2 = arith.constant 0 : i32
    return %arg1, %1, %c0_i32, %c0_i32_0, %c0_i32_1 : i32, i32, i32, i32, i32
  }
  func.func @transform_2(%arg0: i32, %arg1: i32) -> (i32, i32, i32) {
    %c0_i32 = arith.constant 0 : i32
    %c0_i32_0 = arith.constant 0 : i32
    %c0_i32_1 = arith.constant 0 : i32
    %c0_i32_2 = arith.constant 0 : i32
    return %c0_i32, %c0_i32_0, %c0_i32_1 : i32, i32, i32
  }
  func.func @transform_3(%arg0: i32, %arg1: i32) -> (i32, i32) {
    %c0_i32 = arith.constant 0 : i32
    %c0_i32_0 = arith.constant 0 : i32
    %c0_i32_1 = arith.constant 0 : i32
    return %c0_i32, %c0_i32_0 : i32, i32
  }
  func.func @transform_4(%arg0: i32, %arg1: i32) -> (i32, i32, i32, i32) {
    %c0_i32 = arith.constant 0 : i32
    %c0_i32_0 = arith.constant 0 : i32
    %c0_i32_1 = arith.constant 0 : i32
    return %arg1, %arg0, %c0_i32, %c0_i32_0 : i32, i32, i32, i32
  }
}

</mosaic_0001>

<bundles_post_ra>
// kernel: downsample_forward.1
= control target key start
LH: loop header
LB: loop body
LE: loop exit
PB: predicated region body
PF: predicated region fallthrough
CT: control target
= control target key end

     0   :  { %s2508_s15 = smov 0   ;;  %s2510_s16 = smov 0   ;;  %s2991_s0 = inlined_call_operand.vmem [shape: bf16[2,9,2,9,256], index: 0, kind: input, shape index: {}, may-alias: {0,1}]   ;;  %s2992_s1 = inlined_call_operand.vmem [shape: bf16[2,9,2,9,256], index: 1, kind: input, shape index: {}, may-alias: {0,1}]   ;;  %s2993_s2 = inlined_call_operand.vmem [shape: bf16[3,384,128], index: 2, kind: input, shape index: {}]   ;;  %s2994_s3 = inlined_call_operand.vmem [shape: f32[1,128], index: 3, kind: input, shape index: {}]   ;;  %s2995_s4 = inlined_call_operand.vmem [shape: f32[2,8,8,128], index: 4, kind: output, shape index: {}]  }
   0x1   :  { %s2512_s17 = smov 0  }
   0x2 LB: > { %s23_s18 = sadd.s32 1, %s2477_s16  ;;  %p1877_p0 = scmp.ge.s32.totalorder %s2481_s17, 1  ;;  %s2481_s17 = sphi %s2512_s17, %s14_s17   ;;  %s2477_s16 = sphi %s2510_s16, %s2999_s16   ;;  %s2473_s15 = sphi %s2508_s15, %s2998_s15  }
   0x3   : > { %p24_p1 = scmp.ge.s32.totalorder %s23_s18, 2  ;;  %p222_p2 = scmp.lt.s32.totalorder %s2481_s17, 3 }
   0x5   : > { %s3001_s18 = smov (%p24_p1, %s23_s18), 0  ;;  %p223_p3 = pnand %p1877_p0, %p222_p2 }
   0x6   : > { %v2387_v0 = vld [vmem:[%s2993_s2 + $0x80] sm:$0xff] (!%p223_p3)   ;;  %p283_p4 = scmp.lt.s32.totalorder (!%p223_p3), %s2473_s15, 1  ;;  %v2390_v3 = vld [vmem:[%s2993_s2 + $0x88] sm:$0xff] (!%p223_p3)   ;;  %v2393_v6 = vld [vmem:[%s2993_s2 + $0x90] sm:$0xff] (!%p223_p3)   ;;  %vm390_vm0 = vsmask.f32 (!%p223_p3), 3328 }
   0x7   : > { %226 = sbr.rel (%p223_p3) target bundleno = 335 (0x14f), region = 36  ;;  %v2388_v1 = vld [vmem:[%s2993_s2 + $0x40] sm:$0xff] (!%p223_p3)   ;;  %2248 = vmatprep.subr.bf16.mxu0 (!%p223_p3), %v2387_v0  ;;  %v2391_v4 = vld [vmem:[%s2993_s2 + $0x48] sm:$0xff] (!%p223_p3)   ;;  %v2394_v7 = vld [vmem:[%s2993_s2 + $0x50] sm:$0xff] (!%p223_p3)   ;;  %vm391_vm1 = vsmask.f32 (!%p223_p3), 7440 }
   0x8   : > { %v2389_v2 = vld [vmem:[%s2993_s2] sm:$0xff] (!%p223_p3)   ;;  %2249 = vmatpush3.bf16.msra.mxu0 (!%p223_p3), %v2387_v0  ;;  %2104 = vmatprep.subr.bf16.mxu1 (!%p223_p3), %v2388_v1  ;;  %v2392_v5 = vld [vmem:[%s2993_s2 + $0x8] sm:$0xff] (!%p223_p3)   ;;  %v2395_v8 = vld [vmem:[%s2993_s2 + $0x10] sm:$0xff] (!%p223_p3)  }
   0x9   : > { %2105 = vmatpush3.bf16.msra.mxu1 (!%p223_p3), %v2389_v2  ;;  %2250 = vmatprep.subr.bf16.mxu0 (!%p223_p3), %v2390_v3  ;;  %v2396_v9 = vld [vmem:[%s2993_s2 + $0x98] sm:$0xff] (!%p223_p3)   ;;  %v2399_v12 = vld [vmem:[%s2993_s2 + $0xa0] sm:$0xff] (!%p223_p3)   ;;  %v2402_v15 = vld [vmem:[%s2993_s2 + $0xa8] sm:$0xff] (!%p223_p3)  }
   0xa   : > { %2106 = vmatprep.subr.bf16.mxu1 (!%p223_p3), %v2391_v4  ;;  %v2397_v10 = vld [vmem:[%s2993_s2 + $0x58] sm:$0xff] (!%p223_p3)   ;;  %v2400_v13 = vld [vmem:[%s2993_s2 + $0x60] sm:$0xff] (!%p223_p3)   ;;  %v2403_v16 = vld [vmem:[%s2993_s2 + $0x68] sm:$0xff] (!%p223_p3)  }
   0xb   : > { %v2398_v11 = vld [vmem:[%s2993_s2 + $0x18] sm:$0xff] (!%p223_p3)   ;;  %v2401_v14 = vld [vmem:[%s2993_s2 + $0x20] sm:$0xff] (!%p223_p3)   ;;  %v2404_v17 = vld [vmem:[%s2993_s2 + $0x28] sm:$0xff] (!%p223_p3)  }
   0xc   : > { %2251 = vmatpush3.bf16.msra.mxu0 (!%p223_p3), %v2390_v3  ;;  %v2405_v18 = vld [vmem:[%s2993_s2 + $0xb0] sm:$0xff] (!%p223_p3)   ;;  %v2408_v21 = vld [vmem:[%s2993_s2 + $0xb8] sm:$0xff] (!%p223_p3)   ;;  %v2411_v36 = vld [vmem:[%s2993_s2 + $0x100] sm:$0xff] (!%p223_p3)  }
   0xd   : > { %2107 = vmatpush3.bf16.msra.mxu1 (!%p223_p3), %v2392_v5  ;;  %2252 = vmatprep.subr.bf16.mxu0 (!%p223_p3), %v2393_v6  ;;  %v2406_v19 = vld [vmem:[%s2993_s2 + $0x70] sm:$0xff] (!%p223_p3)   ;;  %v2409_v22 = vld [vmem:[%s2993_s2 + $0x78] sm:$0xff] (!%p223_p3)   ;;  %v2413_v55 = vld [vmem:[%s2993_s2 + $0x1c0] sm:$0xff] (!%p223_p3)  }
   0xe   : > { %s3003_s15 = smov (!%p283_p4, %s2473_s15), 1  ;;  %2108 = vmatprep.subr.bf16.mxu1 %v2394_v7  ;;  %v2407_v20 = vld [vmem:[%s2993_s2 + $0x30] sm:$0xff]   ;;  %v2410_v32 = vld [vmem:[%s2993_s2 + $0x38] sm:$0xff]   ;;  %vm2638_vm2 = vmor %vm390_vm0, %vm391_vm1 }
   0xf   : > { %s2360_s5 = smul.u32 288, %s3003_s15  ;;  %v2414_v1 = vld [vmem:[%s2993_s2 + $0x180] sm:$0xff]  }
  0x10   : > { %2253 = vmatpush3.bf16.msra.mxu0 %v2393_v6 }
  0x11   : > { %2109 = vmatpush3.bf16.msra.mxu1 %v2395_v8  ;;  %2254 = vmatprep.subr.bf16.mxu0 %v2396_v9  ;;  %s2594_s14 = scalar_lea.vmem %s2991_s0, %s2360_s5  ;;  %s2090_s21 = sadd.s32 256, %s2360_s5 }
  0x12   : > { %2110 = vmatprep.subr.bf16.mxu1 %v2397_v10  ;;  %v324_v23 = vld [vmem:[%s2594_s14] sm:$0xff]  ;;  %v325_v24 = vld [vmem:[%s2594_s14 + $0x8] sm:$0x11]  ;;  %s2851_s27 = scalar_lea.vmem %s2992_s1, %s2090_s21 }
  0x13   : > { %v2608_v25 = vld [vmem:[%s2594_s14 + $0x20] sm:$0xff]  ;;  %v329_v26 = vld [vmem:[%s2594_s14 + $0x28] sm:$0x11]  ;;  %v394_v29 = vshrl.u32 %v324_v23, 16  ;;  %v397_v33 = vshll.u32 %v324_v23, 16  ;;  %v403_v34 = vshll.u32 %v325_v24, 16 }
  0x14   : > { %2255 = vmatpush3.bf16.msra.mxu0 %v2396_v9  ;;  %v2612_v27 = vld [vmem:[%s2594_s14 + $0x40] sm:$0xff]  ;;  %v333_v28 = vld [vmem:[%s2594_s14 + $0x48] sm:$0x11]  ;;  %v1895_v30 = vcombine.high %v324_v23, %v2608_v25  ;;  %v1894_v31 = vcombine.low %v324_v23, %v2608_v25  ;;  %v408_v35 = vshrl.u32 %v2608_v25, 16  ;;  %v411_v38 = vshll.u32 %v2608_v25, 16  ;;  %v2425_v23 = vld [vmem:[%s2993_s2 + $0x1d8] sm:$0xff]  }
  0x15   : > { %2111 = vmatpush3.bf16.msra.mxu1 %v2398_v11  ;;  %2256 = vmatprep.subr.bf16.mxu0 %v2399_v12  ;;  %v396_v37 = vrot.slane %v394_v29, 4  ;;  %v417_v39 = vshll.u32 %v329_v26, 16  ;;  %v422_v40 = vshrl.u32 %v2612_v27, 16  ;;  %v399_v41 = vrot.slane %v397_v33, 5  ;;  %v2628_v49 = vld [vmem:[%s2594_s14 + $0x60] sm:$0xff]  ;;  %v2426_v24 = vld [vmem:[%s2993_s2 + $0x198] sm:$0xff]  }
  0x16   : > { %2112 = vmatprep.subr.bf16.mxu1 %v2400_v13  ;;  %818 = vmatprep.mubr.bf16.mxu1 %v1895_v30  ;;  %v405_v42 = vrot.slane %v403_v34, 5  ;;  %v410_v43 = vrot.slane %v408_v35, 4  ;;  %v425_v44 = vshll.u32 %v2612_v27, 16  ;;  %v413_v45 = vrot.slane %v411_v38, 5  ;;  %v337_v52 = vld [vmem:[%s2594_s14 + $0x68] sm:$0x11] }
  0x17   : > { %v419_v46 = vrot.slane %v417_v39, 5  ;;  %v424_v47 = vrot.slane %v422_v40, 4  ;;  %v431_v48 = vshll.u32 %v333_v28, 16  ;;  %v400_v50 = vor.u32 %v399_v41, %v396_v37  ;;  %v2412_v11 = vld [vmem:[%s2993_s2 + $0xc0] sm:$0xff]   ;;  %v2423_v26 = vld [vmem:[%s2993_s2 + $0x118] sm:$0xff]  }
  0x18   : > { %2257 = vmatpush3.bf16.msra.mxu0 %v2399_v12  ;;  %v427_v51 = vrot.slane %v425_v44, 5  ;;  %v436_v53 = vshrl.u32 %v2628_v49, 16  ;;  %v439_v54 = vshll.u32 %v2628_v49, 16  ;;  %v414_v57 = vor.u32 %v413_v45, %v410_v43  ;;  %v2417_v12 = vld [vmem:[%s2993_s2 + $0x1c8] sm:$0xff]   ;;  %v2703_v28 = vld [vmem:[%s2594_s14 + $0x80] sm:$0xff]  ;;  %v2424_v30 = vld [vmem:[%s2993_s2 + $0xd8] sm:$0xff]  }
  0x19   : > { %2113 = vmatpush3.bf16.msra.mxu1 %v2401_v14  ;;  %2258 = vmatprep.subr.bf16.mxu0 %v2402_v15  ;;  %v433_v58 = vrot.slane %v431_v48, 5  ;;  %v445_v59 = vshll.u32 %v337_v52, 16  ;;  %v1897_v60 = vcombine.high %v2612_v27, %v2628_v49  ;;  %v401_v61 = vrot.slane %v400_v50, 4  ;;  %v2418_v14 = vld [vmem:[%s2993_s2 + $0x188] sm:$0xff]   ;;  %v2706_v29 = vld [vmem:[%s2594_s14 + $0xa0] sm:$0xff] }
  0x1a   : > { %2114 = vmatprep.subr.bf16.mxu1 %v2403_v16  ;;  %v428_v62 = vor.u32 %v427_v51, %v424_v47  ;;  %v438_v63 = vrot.slane %v436_v53, 4  ;;  %v441_v0 = vrot.slane %v439_v54, 5  ;;  %v415_v2 = vrot.slane %v414_v57, 4  ;;  %v2415_v16 = vld [vmem:[%s2993_s2 + $0x108] sm:$0xff]   ;;  %v2429_v34 = vld [vmem:[%s2993_s2 + $0x1e0] sm:$0xff]  }
  0x1b   : > { %v406_v3 = vsel %vm2638_vm2, %v401_v61, %v405_v42  ;;  %v447_v6 = vrot.slane %v445_v59, 5  ;;  %v450_v33 = vshrl.u32 %v2703_v28, 16  ;;  %v453_v35 = vshll.u32 %v2703_v28, 16  ;;  %v2427_v38 = vld [vmem:[%s2993_s2 + $0x120] sm:$0xff]   ;;  %v2431_v42 = vld [vmem:[%s2993_s2 + $0x128] sm:$0xff]  }
  0x1c   : > { %2259 = vmatpush3.bf16.msra.mxu0 %v2402_v15  ;;  %v429_v4 = vrot.slane %v428_v62, 4  ;;  %v442_v5 = vor.u32 %v441_v0, %v438_v63  ;;  %v2651_v7 = vsel %vm2638_vm2, %v415_v2, %v419_v46  ;;  %v2428_v40 = vld [vmem:[%s2993_s2 + $0xe0] sm:$0xff]   ;;  %v464_v41 = vshrl.u32 %v2706_v29, 16  ;;  %v2433_v43 = vld [vmem:[%s2993_s2 + $0x1e8] sm:$0xff]  }
  0x1d   : > { %2115 = vmatpush3.bf16.msra.mxu1 %v2404_v17  ;;  %2260 = vmatprep.subr.bf16.mxu0 %v2405_v18  ;;  %v1882_v9 = vcombine.low %v406_v3, %v2651_v7  ;;  %v1896_v17 = vcombine.low %v2612_v27, %v2628_v49  ;;  %v452_v37 = vrot.slane %v450_v33, 4  ;;  %v455_v39 = vrot.slane %v453_v35, 5  ;;  %v341_v46 = vld [vmem:[%s2594_s14 + $0x88] sm:$0x11]  ;;  %v2746_v57 = vld [vmem:[%s2594_s14 + $0xc0] sm:$0xff]  ;;  %v2439_v33 = vld [vmem:[%s2993_s2 + $0x138] sm:$0xff]  }
  0x1e   : > { %2116 = vmatprep.subr.bf16.mxu1 %v2406_v19  ;;  %v2655_v8 = vsel %vm2638_vm2, %v429_v4, %v433_v58  ;;  %v443_v10 = vrot.slane %v442_v5, 4  ;;  %v2421_v19 = vld [vmem:[%s2993_s2 + $0x1d0] sm:$0xff]   ;;  %v467_v45 = vshll.u32 %v2706_v29, 16  ;;  %v345_v47 = vld [vmem:[%s2594_s14 + $0xa8] sm:$0x11]  ;;  %v466_v48 = vrot.slane %v464_v41, 4 }
  0x1f   : > { %2264 = vmatprep.mubr.bf16.mxu0 %v1882_v9  ;;  %v456_v44 = vor.u32 %v455_v39, %v452_v37  ;;  %v2434_v50 = vld [vmem:[%s2993_s2 + $0x1a8] sm:$0xff]   ;;  %v459_v52 = vshll.u32 %v341_v46, 16  ;;  %v473_v54 = vshll.u32 %v345_v47, 16  ;;  %v2750_v62 = vld [vmem:[%s2594_s14 + $0xe0] sm:$0xff]  ;;  %v478_v0 = vshrl.u32 %v2746_v57, 16  ;;  %v2440_v35 = vld [vmem:[%s2993_s2 + $0xf8] sm:$0xff]  }
  0x20   : > { %2261 = vmatpush3.bf16.msra.mxu0 %v2405_v18  ;;  %v2666_v13 = vsel %vm2638_vm2, %v443_v10, %v447_v6  ;;  %v2416_v18 = vld [vmem:[%s2993_s2 + $0xc8] sm:$0xff]   ;;  %v469_v53 = vrot.slane %v467_v45, 5  ;;  %v492_v3 = vshrl.u32 %v2750_v62, 16  ;;  %v495_v4 = vshll.u32 %v2750_v62, 16  ;;  %v2441_v37 = vld [vmem:[%s2993_s2 + $0x1f8] sm:$0xff]   ;;  %v2444_v46 = vld [vmem:[%s2993_s2 + $0x200] sm:$0xff]  }
  0x21   : > { %2117 = vmatpush3.bf16.msra.mxu1 %v2407_v20  ;;  %2262 = vmatprep.subr.bf16.mxu0 %v2408_v21  ;;  %v1883_v15 = vcombine.low %v2655_v8, %v2666_v13  ;;  %v2422_v20 = vld [vmem:[%s2993_s2 + $0x190] sm:$0xff]   ;;  %v457_v51 = vrot.slane %v456_v44, 4  ;;  %v349_v58 = vld [vmem:[%s2594_s14 + $0xc8] sm:$0x11]  ;;  %v461_v59 = vrot.slane %v459_v52, 5  ;;  %v475_v61 = vrot.slane %v473_v54, 5 }
  0x22   : > { %2118 = vmatprep.subr.bf16.mxu1 %v2409_v22  ;;  %v2420_v22 = vld [vmem:[%s2993_s2 + $0xd0] sm:$0xff]   ;;  %v353_v63 = vld [vmem:[%s2594_s14 + $0xe8] sm:$0x11]  ;;  %v487_v2 = vshll.u32 %v349_v58, 16  ;;  %v480_v9 = vrot.slane %v478_v0, 4  ;;  %v2442_v41 = vld [vmem:[%s2993_s2 + $0x1b8] sm:$0xff]   ;;  %v2034_v45 = vcombine.low %v2608_v25, %v2612_v27  ;;  %v2037_v47 = vcombine.high %v2628_v49, %v2703_v28 }
  0x23   : > { %v2759_v5 = vsel %vm2638_vm2, %v457_v51, %v461_v59  ;;  %v501_v10 = vshll.u32 %v353_v63, 16  ;;  %v2443_v44 = vld [vmem:[%s2993_s2 + $0x140] sm:$0xff]   ;;  %v2445_v51 = vld [vmem:[%s2993_s2 + $0x148] sm:$0xff]   ;;  %v2036_v54 = vcombine.low %v2628_v49, %v2703_v28  ;;  %v2447_v49 = vld [vmem:[%s2993_s2 + $0x150] sm:$0xff]  }
  0x24   : > { %2263 = vmatpush3.bf16.msra.mxu0 %v2408_v21  ;;  %v2419_v21 = vld [vmem:[%s2993_s2 + $0x110] sm:$0xff]  }
  0x25   : > { %2119 = vmatpush3.bf16.msra.mxu1 %v2410_v32  ;;  %2144 = vmatprep.subr.bf16.mxu0 %v2411_v36  ;;  %v1898_v32 = vcombine.low %v2703_v28, %v2706_v29  ;;  %v2430_v36 = vld [vmem:[%s2993_s2 + $0x1a0] sm:$0xff]  }
  0x26   : > { %2196 = vmatprep.subr.bf16.mxu1 %v2413_v55  ;;  %v2432_v55 = vld [vmem:[%s2993_s2 + $0xe8] sm:$0xff]  }
  0x27   : > { %2265 = vmatmul.mubr.bf16.vlgmr.msra.gmra.mrb[0].mxu0 %v1883_v15 }
  0x28   : > { %819 = vmatmul.mubr.bf16.vlgmr.msra.gmra.mrb[0].mxu1 %v1894_v31  ;;  %2145 = vmatpush3.bf16.msra.mxu0 %v2412_v11  ;;  %v1899_v31 = vcombine.high %v2703_v28, %v2706_v29  ;;  %v2435_v11 = vld [vmem:[%s2993_s2 + $0x130] sm:$0xff]   ;;  %v2450_v28 = vld [vmem:[%s2993_s2 + $0x218] sm:$0xff]  }
  0x29   : > { %2197 = vmatpush3.bf16.msra.mxu1 %v2414_v1  ;;  %826 = vmatprep.mubr.bf16.mxu1 %v1897_v60  ;;  %v470_v60 = vor.u32 %v469_v53, %v466_v48  ;;  %v481_v1 = vshll.u32 %v2746_v57, 16  ;;  %v2446_v48 = vld [vmem:[%s2993_s2 + $0x208] sm:$0xff]   ;;  %v2448_v53 = vld [vmem:[%s2993_s2 + $0x210] sm:$0xff]  }
  0x2a   : > { %2198 = vmatprep.subr.bf16.mxu1 %v2417_v12  ;;  %2146 = vmatprep.subr.bf16.mxu0 %v2415_v16  ;;  %v497_v16 = vrot.slane %v495_v4, 5  ;;  %v2846_v4 = vld [vmem:[%s2594_s14 + $0xb0] sm:$0xff] }
  0x2b   : > { %v471_v6 = vrot.slane %v470_v60, 4  ;;  %v483_v12 = vrot.slane %v481_v1, 5 }
  0x2c   : > { %2147 = vmatpush3.bf16.msra.mxu0 %v2416_v18  ;;  %v2436_v18 = vld [vmem:[%s2993_s2 + $0xf0] sm:$0xff]  }
  0x2d   : > { %2199 = vmatpush3.bf16.msra.mxu1 %v2418_v14  ;;  %2148 = vmatprep.subr.bf16.mxu0 %v2419_v21  ;;  %v494_v14 = vrot.slane %v492_v3, 4  ;;  %v2766_v15 = vsel %vm2638_vm2, %v471_v6, %v475_v61  ;;  %v484_v21 = vor.u32 %v483_v12, %v480_v9  ;;  %v2843_v3 = vld [vmem:[%s2594_s14 + $0x90] sm:$0xff] }
  0x2e   : > { %2200 = vmatprep.subr.bf16.mxu1 %v2421_v19  ;;  %v2035_v19 = vcombine.high %v2608_v25, %v2612_v27  ;;  %v338_v25 = vld [vmem:[%s2594_s14 + $0x70] sm:$0xff]  ;;  %v1955_v12 = vcombine.high %v2843_v3, %v2846_v4 }
  0x2f   : > { %v1136_v1 = vshrl.u32 %v338_v25, 16 }
  0x30   : > { %827 = vmatmul.mubr.bf16.gmra.mrb[4].mxu1 %v1896_v17  ;;  %2149 = vmatpush3.bf16.msra.mxu0 %v2420_v22  ;;  %v1901_v17 = vcombine.high %v2746_v57, %v2750_v62  ;;  %v489_v22 = vrot.slane %v487_v2, 5  ;;  %v1139_v2 = vshll.u32 %v338_v25, 16 }
  0x31   : > { %2201 = vmatpush3.bf16.msra.mxu1 %v2422_v20  ;;  %834 = vmatprep.mubr.bf16.mxu1 %v1899_v31  ;;  %v1884_v20 = vcombine.low %v2759_v5, %v2766_v15  ;;  %v2438_v31 = vld [vmem:[%s2993_s2 + $0x1b0] sm:$0xff]  }
  0x32   : > { %2202 = vmatprep.subr.bf16.mxu1 %v2425_v23  ;;  %2150 = vmatprep.subr.bf16.mxu0 %v2423_v26  ;;  %v1900_v23 = vcombine.low %v2746_v57, %v2750_v62  ;;  %v498_v26 = vor.u32 %v497_v16, %v494_v14 }
  0x33   : > { %2268 = vmatprep.mubr.bf16.mxu0 %v1884_v20  ;;  %v2452_v20 = vld [vmem:[%s2993_s2 + $0x220] sm:$0xff]  }
  0x34   : > { %2151 = vmatpush3.bf16.msra.mxu0 %v2424_v30  ;;  %v503_v30 = vrot.slane %v501_v10, 5 }
  0x35   : > { %2203 = vmatpush3.bf16.msra.mxu1 %v2426_v24  ;;  %2152 = vmatprep.subr.bf16.mxu0 %v2427_v38  ;;  %v2437_v24 = vld [vmem:[%s2993_s2 + $0x1f0] sm:$0xff]  }
  0x36   : > { %2204 = vmatprep.subr.bf16.mxu1 %v2429_v34  ;;  %v499_v34 = vrot.slane %v498_v26, 4  ;;  %v326_v38 = vld [vmem:[%s2594_s14 + $0x10] sm:$0xff]  ;;  %v2866_v26 = vld [vmem:[%s2851_s27] sm:$0xff] }
  0x37   : > { %v1094_v58 = vshrl.u32 %v326_v38, 16  ;;  %v1097_v59 = vshll.u32 %v326_v38, 16 }
  0x38   : > { %835 = vmatmul.mubr.bf16.gmra.mrb[8].mxu1 %v1898_v32  ;;  %2153 = vmatpush3.bf16.msra.mxu0 %v2428_v40  ;;  %v485_v32 = vrot.slane %v484_v21, 4  ;;  %v2801_v39 = vsel %vm2638_vm2, %v499_v34, %v503_v30  ;;  %v330_v40 = vld [vmem:[%s2594_s14 + $0x30] sm:$0xff]  ;;  %v1141_v21 = vrot.slane %v1139_v2, 5  ;;  %v1164_v30 = vshrl.u32 %v2846_v4, 16 }
  0x39   : > { %2205 = vmatpush3.bf16.msra.mxu1 %v2430_v36  ;;  %2154 = vmatprep.subr.bf16.mxu0 %v2431_v42  ;;  %v1950_v27 = vcombine.low %v326_v38, %v330_v40  ;;  %v1108_v60 = vshrl.u32 %v330_v40, 16  ;;  %v1111_v61 = vshll.u32 %v330_v40, 16  ;;  %v1096_v9 = vrot.slane %v1094_v58, 4 }
  0x3a   : > { %2206 = vmatprep.subr.bf16.mxu1 %v2433_v43  ;;  %842 = vmatprep.mubr.bf16.mxu1 %v1901_v17  ;;  %v2793_v36 = vsel %vm2638_vm2, %v485_v32, %v489_v22  ;;  %v1951_v43 = vcombine.high %v326_v38, %v330_v40  ;;  %v1099_v10 = vrot.slane %v1097_v59, 5  ;;  %v1150_v22 = vshrl.u32 %v2843_v3, 16  ;;  %v2454_v32 = vld [vmem:[%s2993_s2 + $0x228] sm:$0xff]  }
  0x3b   : > { %v1885_v42 = vcombine.low %v2793_v36, %v2801_v39  ;;  %v1110_v14 = vrot.slane %v1108_v60, 4  ;;  %v1113_v16 = vrot.slane %v1111_v61, 5  ;;  %v2074_v40 = vcombine.low %v2651_v7, %v2655_v8 }
  0x3c   : > { %2155 = vmatpush3.bf16.msra.mxu0 %v2432_v55  ;;  %v2039_v55 = vcombine.high %v2706_v29, %v2746_v57  ;;  %v1100_v34 = vor.u32 %v1099_v10, %v1096_v9  ;;  %v2040_v61 = vcombine.low %v2750_v62, %v2866_v26  ;;  %v1580_v2 = vshrl.u32 %v2866_v26, 16  ;;  %v357_v10 = vld [vmem:[%s2851_s27 + $0x8] sm:$0x11] }
  0x3d   : > { %2207 = vmatpush3.bf16.msra.mxu1 %v2434_v50  ;;  %2156 = vmatprep.subr.bf16.mxu0 %v2435_v11  ;;  %v334_v50 = vld [vmem:[%s2594_s14 + $0x50] sm:$0xff]  ;;  %v1114_v38 = vor.u32 %v1113_v16, %v1110_v14 }
  0x3e   : > { %2208 = vmatprep.subr.bf16.mxu1 %v2437_v24  ;;  %2269 = vmatmul.mubr.bf16.gmra.mrb[4].mxu0 %v1885_v42  ;;  %v1953_v52 = vcombine.high %v334_v50, %v338_v25  ;;  %v1122_v63 = vshrl.u32 %v334_v50, 16  ;;  %v1125_v0 = vshll.u32 %v334_v50, 16  ;;  %v1952_v6 = vcombine.low %v334_v50, %v338_v25  ;;  %v331_v42 = vld [vmem:[%s2594_s14 + $0x38] sm:$0x11]  ;;  %v2455_v14 = vld [vmem:[%s2993_s2 + $0x170] sm:$0xff]  }
  0x3f   : > { %1052 = vmatprep.mubr.bf16.mxu0 %v1951_v43  ;;  %v2038_v24 = vcombine.low %v2706_v29, %v2746_v57  ;;  %v2041_v29 = vcombine.high %v2750_v62, %v2866_v26  ;;  %v1167_v57 = vshll.u32 %v2846_v4, 16  ;;  %v1152_v43 = vrot.slane %v1150_v22, 4  ;;  %v335_v50 = vld [vmem:[%s2594_s14 + $0x58] sm:$0x11] }
  0x40   : > { %843 = vmatmul.mubr.bf16.gmra.mrb[12].mxu1 %v1900_v23  ;;  %2157 = vmatpush3.bf16.msra.mxu0 %v2436_v18  ;;  %v1124_v11 = vrot.slane %v1122_v63, 4  ;;  %v1127_v17 = vrot.slane %v1125_v0, 5  ;;  %v1138_v18 = vrot.slane %v1136_v1, 4  ;;  %v1153_v23 = vshll.u32 %v2843_v3, 16  ;;  %v339_v25 = vld [vmem:[%s2594_s14 + $0x78] sm:$0x11] }
  0x41   : > { %1538 = vmatprep.mubr.bf16.mxu1 %v2035_v19  ;;  %2209 = vmatpush3.bf16.msra.mxu1 %v2438_v31  ;;  %v2449_v19 = vld [vmem:[%s2993_s2 + $0x158] sm:$0xff]   ;;  %v2451_v31 = vld [vmem:[%s2993_s2 + $0x160] sm:$0xff]   ;;  %v1101_v8 = vrot.slane %v1100_v34, 4  ;;  %v1115_v58 = vrot.slane %v1114_v38, 4  ;;  %v1131_v63 = vshll.u32 %v335_v50, 16 }
  0x42   : > { %2158 = vmatprep.subr.bf16.mxu0 %v2439_v33  ;;  %2210 = vmatprep.subr.bf16.mxu1 %v2441_v37  ;;  %v2879_v33 = vld [vmem:[%s2594_s14 + $0xd0] sm:$0xff]  ;;  %v343_v0 = vld [vmem:[%s2594_s14 + $0x98] sm:$0x11] }
  0x43   : > { %v2882_v37 = vld [vmem:[%s2594_s14 + $0xf0] sm:$0xff]  ;;  %v1178_v60 = vshrl.u32 %v2879_v33, 16 }
  0x44   : > { %2159 = vmatpush3.bf16.msra.mxu0 %v2440_v35  ;;  %v1128_v35 = vor.u32 %v1127_v17, %v1124_v11  ;;  %v1957_v7 = vcombine.high %v2879_v33, %v2882_v37  ;;  %v1192_v62 = vshrl.u32 %v2882_v37, 16  ;;  %v1195_v9 = vshll.u32 %v2882_v37, 16  ;;  %v2458_v11 = vld [vmem:[%s2993_s2 + $0x238] sm:$0xff]  }
  0x45   : > { %2211 = vmatpush3.bf16.msra.mxu1 %v2442_v41  ;;  %2272 = vmatprep.subr.bf16.mxu0 %v2443_v44  ;;  %v327_v41 = vld [vmem:[%s2594_s14 + $0x18] sm:$0x11] }
  0x46   : > { %2296 = vmatprep.subr.bf16.mxu1 %v2444_v46  ;;  %v1194_v34 = vrot.slane %v1192_v62, 4 }
  0x47   : > { %1053 = vmatmul.mubr.bf16.vlgmr.msra.gmra.mrb[8].mxu0 %v1950_v27  ;;  %v1166_v27 = vrot.slane %v1164_v30, 4 }
  0x48   : > { %1539 = vmatmul.mubr.bf16.vlgmr.msra.gmra.mrb[16].mxu1 %v2034_v45  ;;  %2273 = vmatpush3.bf16.msra.mxu0 %v2443_v44  ;;  %v1155_v44 = vrot.slane %v1153_v23, 5  ;;  %v1142_v45 = vor.u32 %v1141_v21, %v1138_v18  ;;  %v1159_v18 = vshll.u32 %v343_v0, 16  ;;  %v1133_v21 = vrot.slane %v1131_v63, 5 }
  0x49   : > { %2297 = vmatpush3.bf16.msra.mxu1 %v2444_v46  ;;  %1546 = vmatprep.mubr.bf16.mxu1 %v2037_v47  ;;  %v1954_v46 = vcombine.low %v2843_v3, %v2846_v4  ;;  %v1103_v47 = vshll.u32 %v327_v41, 16  ;;  %v1583_v3 = vshll.u32 %v2866_v26, 16  ;;  %v1145_v4 = vshll.u32 %v339_v25, 16 }
  0x4a   : > { %2298 = vmatprep.subr.bf16.mxu1 %v2446_v48  ;;  %1060 = vmatprep.mubr.bf16.mxu0 %v1953_v52  ;;  %v2894_v52 = vrot.slane %v1128_v35, 4  ;;  %v2907_v1 = vrot.slane %v1142_v45, 4  ;;  %v1180_v23 = vrot.slane %v1178_v60, 4  ;;  %v1582_v26 = vrot.slane %v1580_v2, 4 }
  0x4b   : > { %2274 = vmatprep.subr.bf16.mxu0 %v2445_v51  ;;  %v1585_v30 = vrot.slane %v1583_v3, 5  ;;  %v1197_v35 = vrot.slane %v1195_v9, 5 }
  0x4c   : > { %2275 = vmatpush3.bf16.msra.mxu0 %v2445_v51  ;;  %v1169_v51 = vrot.slane %v1167_v57, 5  ;;  %v1134_v45 = vsel %vm2638_vm2, %v2894_v52, %v1133_v21 }
  0x4d   : > { %2299 = vmatpush3.bf16.msra.mxu1 %v2446_v48  ;;  %2276 = vmatprep.subr.bf16.mxu0 %v2447_v49  ;;  %v1117_v48 = vshll.u32 %v331_v42, 16  ;;  %v1586_v42 = vor.u32 %v1585_v30, %v1582_v26 }
  0x4e   : > { %2300 = vmatprep.subr.bf16.mxu1 %v2448_v53 }
  0x4f   : > { %1061 = vmatmul.mubr.bf16.gmra.mrb[12].mxu0 %v1952_v6  ;;  %v1119_v59 = vrot.slane %v1117_v48, 5  ;;  %v1181_v6 = vshll.u32 %v2879_v33, 16 }
  0x50   : > { %1547 = vmatmul.mubr.bf16.gmra.mrb[20].mxu1 %v2036_v54  ;;  %2277 = vmatpush3.bf16.msra.mxu0 %v2447_v49  ;;  %v2456_v54 = vld [vmem:[%s2993_s2 + $0x230] sm:$0xff]   ;;  %v347_v49 = vld [vmem:[%s2594_s14 + $0xb8] sm:$0x11] }
  0x51   : > { %2301 = vmatpush3.bf16.msra.mxu1 %v2448_v53  ;;  %1554 = vmatprep.mubr.bf16.mxu1 %v2039_v55  ;;  %v2453_v53 = vld [vmem:[%s2993_s2 + $0x168] sm:$0xff]   ;;  %v1105_v55 = vrot.slane %v1103_v47, 5  ;;  %v1120_v17 = vsel %vm2638_vm2, %v1115_v58, %v1119_v59  ;;  %v1183_v57 = vrot.slane %v1181_v6, 5  ;;  %v1587_v47 = vrot.slane %v1586_v42, 4 }
  0x52   : > { %2302 = vmatprep.subr.bf16.mxu1 %v2450_v28  ;;  %1068 = vmatprep.mubr.bf16.mxu0 %v1955_v12  ;;  %v1170_v12 = vor.u32 %v1169_v51, %v1166_v27 }
  0x53   : > { %2278 = vmatprep.subr.bf16.mxu0 %v2449_v19  ;;  %v1106_v16 = vsel %vm2638_vm2, %v1101_v8, %v1105_v55 }
  0x54   : > { %2279 = vmatpush3.bf16.msra.mxu0 %v2449_v19  ;;  %v1173_v19 = vshll.u32 %v347_v49, 16  ;;  %v1171_v38 = vrot.slane %v1170_v12, 4 }
  0x55   : > { %2303 = vmatpush3.bf16.msra.mxu1 %v2450_v28  ;;  %2280 = vmatprep.subr.bf16.mxu0 %v2451_v31  ;;  %v1156_v28 = vor.u32 %v1155_v44, %v1152_v43  ;;  %v2075_v43 = vcombine.low %v2666_v13, %v2759_v5  ;;  %v2076_v44 = vcombine.low %v2766_v15, %v2793_v36 }
  0x56   : > { %2304 = vmatprep.subr.bf16.mxu1 %v2452_v20  ;;  %v1175_v41 = vrot.slane %v1173_v19, 5  ;;  %v1198_v13 = vor.u32 %v1197_v35, %v1194_v34 }
  0x57   : > { %1069 = vmatmul.mubr.bf16.gmra.mrb[16].mxu0 %v1954_v46  ;;  %v1157_v22 = vrot.slane %v1156_v28, 4 }
  0x58   : > { %1555 = vmatmul.mubr.bf16.gmra.mrb[24].mxu1 %v2038_v24  ;;  %2281 = vmatpush3.bf16.msra.mxu0 %v2451_v31  ;;  %v1147_v24 = vrot.slane %v1145_v4, 5  ;;  %v1589_v31 = vshll.u32 %v357_v10, 16  ;;  %v1176_v36 = vsel %vm2638_vm2, %v1171_v38, %v1175_v41 }
  0x59   : > { %2305 = vmatpush3.bf16.msra.mxu1 %v2452_v20  ;;  %1562 = vmatprep.mubr.bf16.mxu1 %v2041_v29  ;;  %v1956_v20 = vcombine.low %v2879_v33, %v2882_v37  ;;  %v351_v29 = vld [vmem:[%s2594_s14 + $0xd8] sm:$0x11]  ;;  %v1161_v37 = vrot.slane %v1159_v18, 5 }
  0x5a   : > { %2306 = vmatprep.subr.bf16.mxu1 %v2454_v32  ;;  %1076 = vmatprep.mubr.bf16.mxu0 %v1957_v7  ;;  %v2457_v33 = vld [vmem:[%s2993_s2 + $0x178] sm:$0xff]   ;;  %v1187_v46 = vshll.u32 %v351_v29, 16  ;;  %v1591_v48 = vrot.slane %v1589_v31, 5  ;;  %v1148_v50 = vsel %vm2638_vm2, %v2907_v1, %v1147_v24  ;;  %v1184_v7 = vor.u32 %v1183_v57, %v1180_v23 }
  0x5b   : > { %2282 = vmatprep.subr.bf16.mxu0 %v2453_v53  ;;  %v1162_v15 = vsel %vm2638_vm2, %v1157_v22, %v1161_v37  ;;  %v1991_v8 = vcombine.low %v1134_v45, %v1148_v50 }
  0x5c   : > { %2283 = vmatpush3.bf16.msra.mxu0 %v2453_v53  ;;  %v1189_v25 = vrot.slane %v1187_v46, 5  ;;  %v1592_v27 = vsel %vm2638_vm2, %v1587_v47, %v1591_v48  ;;  %v1992_v51 = vcombine.low %v1162_v15, %v1176_v36  ;;  %v1185_v52 = vrot.slane %v1184_v7, 4 }
  0x5d   : > { %2307 = vmatpush3.bf16.msra.mxu1 %v2454_v32  ;;  %v1990_v32 = vcombine.low %v1106_v16, %v1120_v17  ;;  %2284 = vmatprep.subr.bf16.mxu0 %v2455_v14  ;;  %v1199_v53 = vrot.slane %v1198_v13, 4  ;;  %v2077_v55 = vcombine.low %v2801_v39, %v1592_v27 }
  0x5e   : > { %2308 = vmatprep.subr.bf16.mxu1 %v2456_v54  ;;  %v1190_v58 = vsel %vm2638_vm2, %v1185_v52, %v1189_v25 }
  0x5f   : > { %1077 = vmatmul.mubr.bf16.gmra.mrb[20].mxu0 %v1956_v20 }
  0x60   : > { %1563 = vmatmul.mubr.bf16.gmra.mrb[28].mxu1 %v2040_v61  ;;  %2285 = vmatpush3.bf16.msra.mxu0 %v2455_v14 }
  0x61   : > { %2309 = vmatpush3.bf16.msra.mxu1 %v2456_v54  ;;  %2312 = vmatprep.mubr.bf16.mxu1 %v2074_v40  ;;  %v355_v40 = vld [vmem:[%s2594_s14 + $0xf8] sm:$0x11]  ;;  %s2091_s14 = sshll.u32 %s3003_s15, 6 }
  0x62   : > { %2310 = vmatprep.subr.bf16.mxu1 %v2458_v11  ;;  %2288 = vmatprep.mubr.bf16.mxu0 %v1990_v32  ;;  %v1201_v5 = vshll.u32 %v355_v40, 16  ;;  %s2969_s29 = scalar_lea.vmem %s2995_s4, %s2091_s14 }
  0x63   : > { %2286 = vmatprep.subr.bf16.mxu0 %v2457_v33 }
  0x64   : > { %2287 = vmatpush3.bf16.msra.mxu0 %v2457_v33  ;;  %v1203_v54 = vrot.slane %v1201_v5, 5 }
  0x65   : > { %2311 = vmatpush3.bf16.msra.mxu1 %v2458_v11 }
  0x66   : > { %v1204_v59 = vsel %vm2638_vm2, %v1199_v53, %v1203_v54 }
  0x67   : > { %2289 = vmatmul.mubr.bf16.vlgmr.msra.gmra.mrb[0].mxu0 %v1991_v8  ;;  %v1993_v60 = vcombine.low %v1190_v58, %v1204_v59 }
  0x68   : > { %2313 = vmatmul.mubr.bf16.vlgmr.msra.gmra.mrb[32].mxu1 %v2075_v43  ;;  %2292 = vmatprep.mubr.bf16.mxu0 %v1992_v51 }
  0x69   : > { %2316 = vmatprep.mubr.bf16.mxu1 %v2076_v44 }
  0x6f   : > { %2293 = vmatmul.mubr.bf16.gmra.mrb[4].mxu0 %v1993_v60 }
  0x70   : > { %2317 = vmatmul.mubr.bf16.gmra.mrb[36].mxu1 %v2077_v55 }
  0xfb   : > { %v2120_v61 = vpop.f32.mrb[0].mxu1 }
  0xfc   : > { %v2121_v63 = vpop.f32.mrb[1].mxu1 }
  0xfd   : > { %v2122_v0 = vadd.f32 %v2121_v63, %v2120_v61  ;;  %v2123_v49 = vpop.f32.mrb[2].mxu1 }
  0xfe   : > { %v2124_v28 = vpop.f32.mrb[3].mxu1 }
  0xff   : > { %v2125_v1 = vadd.f32 %v2124_v28, %v2123_v49 }
 0x103   : > { %v2126_v2 = vpop.f32.mrb[4].mxu1 }
 0x104   : > { %v2127_v3 = vpop.f32.mrb[5].mxu1 }
 0x105   : > { %v2128_v39 = vadd.f32 %v2127_v3, %v2126_v2  ;;  %v2129_v4 = vpop.f32.mrb[6].mxu1 }
 0x106   : > { %v2130_v6 = vpop.f32.mrb[7].mxu1 }
 0x107   : > { %v2131_v62 = vadd.f32 %v2130_v6, %v2129_v4 }
 0x10b   : > { %v2132_v9 = vpop.f32.mrb[8].mxu1 }
 0x10c   : > { %v2133_v10 = vpop.f32.mrb[9].mxu1 }
 0x10d   : > { %v2134_v11 = vadd.f32 %v2133_v10, %v2132_v9  ;;  %v2135_v56 = vpop.f32.mrb[10].mxu1 }
 0x10e   : > { %v2136_v12 = vpop.f32.mrb[11].mxu1 }
 0x10f   : > { %v2137_v14 = vadd.f32 %v2136_v12, %v2135_v56 }
 0x113   : > { %v2138_v16 = vpop.f32.mrb[12].mxu1 }
 0x114   : > { %v2139_v17 = vpop.f32.mrb[13].mxu1 }
 0x115   : > { %v2140_v18 = vadd.f32 %v2139_v17, %v2138_v16  ;;  %v2141_v19 = vpop.f32.mrb[14].mxu1 }
 0x116   : > { %v2142_v20 = vpop.f32.mrb[15].mxu1 }
 0x117   : > { %v2143_v21 = vadd.f32 %v2142_v20, %v2141_v19 }
 0x11a   : > { %v2160_v32 = vpop.f32.mrb[8].mxu0 }
 0x11b   : > { %v2212_v22 = vpop.f32.mrb[16].mxu1  ;;  %v2161_v29 = vpop.f32.mrb[9].mxu0 }
 0x11c   : > { %v2213_v23 = vpop.f32.mrb[17].mxu1  ;;  %v2162_v57 = vadd.f32 %v2161_v29, %v2160_v32  ;;  %v2163_v34 = vpop.f32.mrb[10].mxu0 }
 0x11d   : > { %v2953_v24 = vadd.f32 %v2213_v23, %v2212_v22  ;;  %v2215_v26 = vpop.f32.mrb[18].mxu1  ;;  %v2164_v35 = vpop.f32.mrb[11].mxu0 }
 0x11e   : > { %v2216_v30 = vpop.f32.mrb[19].mxu1  ;;  %v2165_v37 = vadd.f32 %v2164_v35, %v2163_v34  ;;  %v2324_v41 = vadd.f32 %v2162_v57, %v2122_v0  ;;  %v2086_v34 = vld [vmem:[%s2994_s3] ss:$0 sm:$0xff] }
 0x11f   : > { %v2955_v31 = vadd.f32 %v2216_v30, %v2215_v26 }
 0x120   : > { %v2332_v44 = vadd.f32 %v2165_v37, %v2125_v1 }
 0x122   : > { %v2166_v46 = vpop.f32.mrb[12].mxu0 }
 0x123   : > { %v2218_v33 = vpop.f32.mrb[20].mxu1  ;;  %v2167_v47 = vpop.f32.mrb[13].mxu0 }
 0x124   : > { %v2219_v38 = vpop.f32.mrb[21].mxu1  ;;  %v2168_v48 = vadd.f32 %v2167_v47, %v2166_v46  ;;  %v2169_v50 = vpop.f32.mrb[14].mxu0 }
 0x125   : > { %v2220_v40 = vadd.f32 %v2219_v38, %v2218_v33  ;;  %v2221_v42 = vpop.f32.mrb[22].mxu1  ;;  %v2170_v7 = vpop.f32.mrb[15].mxu0 }
 0x126   : > { %v2222_v43 = vpop.f32.mrb[23].mxu1  ;;  %v2171_v5 = vadd.f32 %v2170_v7, %v2169_v50  ;;  %v2320_v36 = vadd.f32 %v2168_v48, %v2128_v39 }
 0x127   : > { %v2223_v45 = vadd.f32 %v2222_v43, %v2221_v42 }
 0x128   : > { %v2328_v51 = vadd.f32 %v2171_v5, %v2131_v62 }
 0x12a   : > { %v2172_v53 = vpop.f32.mrb[16].mxu0 }
 0x12b   : > { %v2224_v13 = vpop.f32.mrb[24].mxu1  ;;  %v2173_v54 = vpop.f32.mrb[17].mxu0 }
 0x12c   : > { %v2225_v15 = vpop.f32.mrb[25].mxu1  ;;  %v2174_v55 = vadd.f32 %v2173_v54, %v2172_v53  ;;  %v2175_v58 = vpop.f32.mrb[18].mxu0 }
 0x12d   : > { %v2957_v8 = vadd.f32 %v2225_v15, %v2224_v13  ;;  %v2227_v25 = vpop.f32.mrb[26].mxu1  ;;  %v2176_v59 = vpop.f32.mrb[19].mxu0 }
 0x12e   : > { %v2228_v27 = vpop.f32.mrb[27].mxu1  ;;  %v2177_v61 = vadd.f32 %v2176_v59, %v2175_v58  ;;  %v2340_v0 = vadd.f32 %v2174_v55, %v2134_v11 }
 0x12f   : > { %v2959_v52 = vadd.f32 %v2228_v27, %v2227_v25 }
 0x130   : > { %v2348_v2 = vadd.f32 %v2177_v61, %v2137_v14 }
 0x132   : > { %v2178_v39 = vpop.f32.mrb[20].mxu0 }
 0x133   : > { %v2230_v60 = vpop.f32.mrb[28].mxu1  ;;  %v2179_v4 = vpop.f32.mrb[21].mxu0 }
 0x134   : > { %v2231_v63 = vpop.f32.mrb[29].mxu1  ;;  %v2180_v6 = vadd.f32 %v2179_v4, %v2178_v39  ;;  %v2181_v62 = vpop.f32.mrb[22].mxu0 }
 0x135   : > { %v2232_v49 = vadd.f32 %v2231_v63, %v2230_v60  ;;  %v2233_v28 = vpop.f32.mrb[30].mxu1  ;;  %v2182_v9 = vpop.f32.mrb[23].mxu0 }
 0x136   : > { %v2234_v1 = vpop.f32.mrb[31].mxu1  ;;  %v2183_v56 = vadd.f32 %v2182_v9, %v2181_v62  ;;  %v2336_v16 = vadd.f32 %v2180_v6, %v2140_v18 }
 0x137   : > { %v2235_v3 = vadd.f32 %v2234_v1, %v2233_v28 }
 0x138   : > { %v2344_v20 = vadd.f32 %v2183_v56, %v2143_v21 }
 0x13a   : > { %v2290_v22 = vpop.f32.mrb[0].mxu0 }
 0x13b   : > { %v2314_v10 = vpop.f32.mrb[32].mxu1  ;;  %v2321_v11 = vadd.f32 %v2320_v36, %v2290_v22  ;;  %v1319_v23 = vpop.f32.mrb[1].mxu0 }
 0x13c   : > { %v1700_v12 = vpop.f32.mrb[33].mxu1  ;;  %v2325_v26 = vadd.f32 %v2324_v41, %v1319_v23  ;;  %v2291_v30 = vpop.f32.mrb[2].mxu0 }
 0x13d   : > { %v2315_v17 = vpop.f32.mrb[34].mxu1  ;;  %v2329_v14 = vadd.f32 %v2328_v51, %v2291_v30  ;;  %v2322_v32 = vadd.f32 %v2321_v11, %v2220_v40  ;;  %v1322_v29 = vpop.f32.mrb[3].mxu0 }
 0x13e   : > { %v1703_v19 = vpop.f32.mrb[35].mxu1  ;;  %v2333_v35 = vadd.f32 %v2332_v44, %v1322_v29  ;;  %v2326_v18 = vadd.f32 %v2325_v26, %v2953_v24 }
 0x13f   : > { %v2323_v37 = vadd.f32 %v2322_v32, %v2314_v10  ;;  %v2330_v21 = vadd.f32 %v2329_v14, %v2223_v45 }
 0x140   : > { %v2327_v41 = vadd.f32 %v2326_v18, %v1700_v12  ;;  %v2334_v40 = vadd.f32 %v2333_v35, %v2955_v31 }
 0x141   : > { %v1748_v43 = vadd.f32 %v2323_v37, %v2086_v34  ;;  %v2331_v44 = vadd.f32 %v2330_v21, %v2315_v17 }
 0x142   : > { %v1746_v24 = vadd.f32 %v2327_v41, %v2086_v34  ;;  %v2335_v46 = vadd.f32 %v2334_v40, %v1703_v19  ;;  %v2294_v47 = vpop.f32.mrb[4].mxu0 }
 0x143   : > { %v2318_v57 = vpop.f32.mrb[36].mxu1  ;;  %1756 = vst [vmem:[%s2969_s29 + $0x10] sm:$0xff] %v1748_v43  ;;  %v1749_v45 = vadd.f32 %v2331_v44, %v2086_v34  ;;  %v2337_v48 = vadd.f32 %v2336_v16, %v2294_v47  ;;  %v1335_v50 = vpop.f32.mrb[5].mxu0 }
 0x144   : > { %v1716_v33 = vpop.f32.mrb[37].mxu1  ;;  %1754 = vst [vmem:[%s2969_s29] sm:$0xff] %v1746_v24  ;;  %v1747_v7 = vadd.f32 %v2335_v46, %v2086_v34  ;;  %v2341_v13 = vadd.f32 %v2340_v0, %v1335_v50  ;;  %v2295_v5 = vpop.f32.mrb[6].mxu0 }
 0x145   : > { %v2319_v38 = vpop.f32.mrb[38].mxu1  ;;  %1757 = vst [vmem:[%s2969_s29 + $0x18] sm:$0xff] %v1749_v45  ;;  %v2345_v15 = vadd.f32 %v2344_v20, %v2295_v5  ;;  %v2338_v31 = vadd.f32 %v2337_v48, %v2232_v49  ;;  %v1338_v36 = vpop.f32.mrb[7].mxu0 }
 0x146   : > { %v1719_v42 = vpop.f32.mrb[39].mxu1  ;;  %1755 = vst [vmem:[%s2969_s29 + $0x8] sm:$0xff] %v1747_v7  ;;  %v2349_v25 = vadd.f32 %v2348_v2, %v1338_v36  ;;  %v2342_v27 = vadd.f32 %v2341_v13, %v2957_v8 }
 0x147   : > { %v2339_v51 = vadd.f32 %v2338_v31, %v2318_v57  ;;  %v2346_v53 = vadd.f32 %v2345_v15, %v2235_v3 }
 0x148   : > { %v2343_v54 = vadd.f32 %v2342_v27, %v1716_v33  ;;  %v2350_v55 = vadd.f32 %v2349_v25, %v2959_v52 }
 0x149   : > { %v1752_v58 = vadd.f32 %v2339_v51, %v2086_v34  ;;  %v2347_v59 = vadd.f32 %v2346_v53, %v2319_v38 }
 0x14a   : > { %v1750_v60 = vadd.f32 %v2343_v54, %v2086_v34  ;;  %v2351_v61 = vadd.f32 %v2350_v55, %v1719_v42 }
 0x14b   : > { %1760 = vst [vmem:[%s2969_s29 + $0x30] sm:$0xff] %v1752_v58  ;;  %v1753_v63 = vadd.f32 %v2347_v59, %v2086_v34 }
 0x14c   : > { %1758 = vst [vmem:[%s2969_s29 + $0x20] sm:$0xff] %v1750_v60  ;;  %v1751_v0 = vadd.f32 %v2351_v61, %v2086_v34 }
 0x14d   : > { %1761 = vst [vmem:[%s2969_s29 + $0x38] sm:$0xff] %v1753_v63 }
 0x14e   : > { %1759 = vst [vmem:[%s2969_s29 + $0x28] sm:$0xff] %v1751_v0 }
 0x14f PF: > { %s14_s17 = sadd.s32 1, %s2481_s17   ;;  %s2998_s15 = smov %s2477_s16 }
 0x150   : > { %p11_p5 = scmp.ge.s32.totalorder %s14_s17, 4   ;;  %s2999_s16 = smov %s3001_s18 }
 0x152   :  { %13 = sbr.rel (!%p11_p5) target bundleno = 2 (0x2), region = 71 }

</bundles_post_ra>
